<compile_context>
chip_gen: v7x
topology: tpu7x:2x2x1
jax: 0.10.0
libtpu: 0.0.40
codegen_flags: <defaults>
</compile_context>

<pallas_src>
import jax
import jax.numpy as jnp
from jax.experimental import pallas as pl
from jax.experimental.pallas import tpu as pltpu

_LANE = 128
_SUB = 8
_VMEM_BUDGET = 40 * 1024 * 1024   # tile-selection budget (v7x has 64 MiB/TC)
_VMEM_LIMIT = 48 * 1024 * 1024    # scoped-VMEM cap, safe on v5e/v6e/v7x


def _round_up(x, m):
    return (x + m - 1) // m * m


def _pad2(a, target_shape):
    pads = [(0, t - s) for s, t in zip(a.shape, target_shape)]
    return jnp.pad(a, pads)


def _wrapper_kernel(x_ref, wb_ref, bb_ref, feat_ref,
                    w1_ref, b1_ref, w2_ref, b2_ref,
                    wr_ref, wf_ref, bfc_ref,
                    out_ref, acc_ref):
    k = pl.program_id(1)

    @pl.when(k == 0)
    def _init():
        acc_ref[...] = jnp.zeros_like(acc_ref)

    # Backbone partial product.  x arrives as f32 straight from HBM (no
    # wrapper-side pad/cast pass); it is cast to bf16 on the VPU right before
    # the MXU.  wb was cast to bf16 once at param-prep time and its output
    # dim stays at rep_dim (no lane padding of the dominant streamed operand).
    # Accumulation is f32.
    acc_ref[...] += jnp.dot(x_ref[...].astype(jnp.bfloat16), wb_ref[...],
                            preferred_element_type=jnp.float32)

    @pl.when(k == pl.num_programs(1) - 1)
    def _finalize():
        # reps = backbone(x)                               [TB, rep_dim]
        reps = acc_ref[...] + bb_ref[...]

        # feature_fc: Linear -> ReLU -> Linear             [TB, HDp]
        h = jnp.dot(feat_ref[...], w1_ref[...],
                    preferred_element_type=jnp.float32) + b1_ref[...]
        h = jnp.maximum(h, 0.0)
        feat_reps = jnp.dot(h, w2_ref[...],
                            preferred_element_type=jnp.float32) + b2_ref[...]

        # fc over concat([reps, feat_reps], 1), concat-free form:
        #   cat @ W_fc == reps @ W_fc[:rep_dim] + feat_reps @ W_fc[rep_dim:]
        out_ref[...] = (
            jnp.dot(reps, wr_ref[...], preferred_element_type=jnp.float32)
            + jnp.dot(feat_reps, wf_ref[...],
                      preferred_element_type=jnp.float32)
            + bfc_ref[...])


def prepare_params(params, *, tb=256, tk_max=8192):
    """One-time parameter preparation (do NOT call per forward pass).

    * backbone weight -> bf16 (halves HBM traffic on the memory-bound GEMM);
      K padded to the reduction tile only if needed; output dim LEFT AT
      rep_dim (no 32->128 lane blowup in HBM).
    * tiny feature_fc / fc weights lane-padded to 128 once (mathematically
      exact: padded lanes stay zero through Linear/ReLU/Linear and the
      concat-free fc).
    """
    wb, bb, w1, b1, w2, b2, wr, wf, bfc = params
    in_dim, rep_dim = wb.shape
    feature_dim, hidden_dim = w1.shape
    n_out = bfc.shape[-1]
    FDp = _round_up(feature_dim, _LANE)
    HDp = _round_up(hidden_dim, _LANE)
    NOp = _round_up(n_out, _LANE)

    # Small weights that stay VMEM-resident across the whole grid.
    small_bytes = 4 * (rep_dim + FDp * HDp + HDp + HDp * HDp + HDp
                       + rep_dim * NOp + HDp * NOp + NOp)

    def footprint(tk):
        return (2 * tb * tk * 4            # x tile (f32, double-buffered)
                + 2 * tk * rep_dim * 2     # wb tile (bf16, double-buffered)
                + 2 * tb * FDp * 4         # features tile
                + 2 * tb * NOp * 4         # output tile
                + 2 * small_bytes          # resident weights (2x to be safe)
                + tb * rep_dim * 4)        # f32 accumulator scratch

    # Largest reduction tile that fits the VMEM budget.  When TK == Kp the wb
    # block index is constant over the entire grid, so wb is fetched from HBM
    # exactly once (no re-streaming across batch tiles).
    TK = min(_round_up(in_dim, _LANE), _round_up(tk_max, _LANE))
    while TK > _LANE and footprint(TK) > _VMEM_BUDGET:
        TK = _round_up(TK // 2, _LANE)
    Kp = _round_up(in_dim, TK)

    wb_p = wb.astype(jnp.bfloat16)
    if Kp != in_dim:                       # only when backbone in_dim is not
        wb_p = _pad2(wb_p, (Kp, rep_dim))  # a multiple of the chosen TK
    return dict(
        wb=wb_p, bb=bb,
        w1=_pad2(w1, (FDp, HDp)), b1=_pad2(b1, (1, HDp)),
        w2=_pad2(w2, (HDp, HDp)), b2=_pad2(b2, (1, HDp)),
        wr=_pad2(wr, (rep_dim, NOp)), wf=_pad2(wf, (HDp, NOp)),
        bfc=_pad2(bfc, (1, NOp)),
        dims=dict(in_dim=in_dim, rep_dim=rep_dim, n_out=n_out,
                  FDp=FDp, HDp=HDp, NOp=NOp, Kp=Kp, TK=TK),
        tb=tb)


def model_wrapper_forward(x, features, prep):
    """Fused forward of ModelWrapper(use_features=True).

    x: [B, C, H, W] f32, features: [B, feature_dim] f32.
    """
    d = prep["dims"]
    in_dim, rep_dim = d["in_dim"], d["rep_dim"]
    FDp, HDp, NOp = d["FDp"], d["HDp"], d["NOp"]
    Kp, TK = d["Kp"], d["TK"]

    B = x.shape[0]
    x_flat = x.reshape(B, -1)              # f32: no dtype-cast pass over x
    assert x_flat.shape[1] == in_dim

    Bp = _round_up(B, _SUB)
    TB = min(prep["tb"], Bp)
    if Bp // TB < 2 and Bp >= 2 * _SUB:
        # Give the second TensorCore (v7x megacore) its own batch tile.
        TB = _round_up(-(-Bp // 2), _SUB)
    Bp = _round_up(Bp, TB)

    if (Bp, Kp) != x_flat.shape:           # tiny batch pad (and K pad only if
        x_flat = _pad2(x_flat, (Bp, Kp))   # the backbone in_dim is unaligned)
    feat_p = _pad2(features, (Bp, FDp))

    grid = (Bp // TB, Kp // TK)

    cost = pl.CostEstimate(
        flops=2 * Bp * (Kp * rep_dim + FDp * HDp + HDp * HDp
                        + (rep_dim + HDp) * NOp),
        transcendentals=0,
        bytes_accessed=(Bp * Kp * 4 + Kp * rep_dim * 2 + Bp * FDp * 4
                        + FDp * HDp * 4 + HDp * HDp * 4
                        + (rep_dim + HDp) * NOp * 4 + Bp * NOp * 4))

    out_padded = pl.pallas_call(
        _wrapper_kernel,
        out_shape=jax.ShapeDtypeStruct((Bp, NOp), jnp.float32),
        grid_spec=pltpu.PrefetchScalarGridSpec(
            num_scalar_prefetch=0,
            grid=grid,
            in_specs=[
                # streamed operands
                pl.BlockSpec((TB, TK), lambda i, k: (i, k)),        # x (f32)
                pl.BlockSpec((TK, rep_dim), lambda i, k: (k, 0)),   # wb (bf16)
                # VMEM-resident operands (constant block index -> fetched
                # once, never re-streamed)
                pl.BlockSpec((1, rep_dim), lambda i, k: (0, 0)),    # bb
                pl.BlockSpec((TB, FDp), lambda i, k: (i, 0)),       # features
                pl.BlockSpec((FDp, HDp), lambda i, k: (0, 0)),      # w1
                pl.BlockSpec((1, HDp), lambda i, k: (0, 0)),        # b1
                pl.BlockSpec((HDp, HDp), lambda i, k: (0, 0)),      # w2
                pl.BlockSpec((1, HDp), lambda i, k: (0, 0)),        # b2
                pl.BlockSpec((rep_dim, NOp), lambda i, k: (0, 0)),  # wr
                pl.BlockSpec((HDp, NOp), lambda i, k: (0, 0)),      # wf
                pl.BlockSpec((1, NOp), lambda i, k: (0, 0)),        # bfc
            ],
            out_specs=pl.BlockSpec((TB, NOp), lambda i, k: (i, 0)),
            scratch_shapes=[pltpu.VMEM((TB, rep_dim), jnp.float32)],
        ),
        compiler_params=pltpu.CompilerParams(
            dimension_semantics=("parallel", "arbitrary"),
            vmem_limit_bytes=_VMEM_LIMIT),
        cost_estimate=cost,
    )(x_flat, prep["wb"], prep["bb"], feat_p, prep["w1"], prep["b1"],
      prep["w2"], prep["b2"], prep["wr"], prep["wf"], prep["bfc"])

    return out_padded[:B, :d["n_out"]]


def _reference_forward(x, features, params):
    """Pure-JAX reference.  Mirrors the kernel's documented bf16 rounding of
    the backbone GEMM operands; everything else is f32 like the PyTorch
    module."""
    wb, bb, w1, b1, w2, b2, wr, wf, bfc = params
    B = x.shape[0]
    x_flat = x.reshape(B, -1)
    xb = x_flat.astype(jnp.bfloat16).astype(jnp.float32)
    wbb = wb.astype(jnp.bfloat16).astype(jnp.float32)
    reps = xb @ wbb + bb
    h = jnp.maximum(features @ w1 + b1, 0.0)
    feat_reps = h @ w2 + b2
    cat = jnp.concatenate([reps, feat_reps], axis=1)
    w_fc = jnp.concatenate([wr, wf], axis=0)
    return cat @ w_fc + bfc


def make_params(key, in_dim, rep_dim, feature_dim, hidden_dim, n_out=2):
    ks = jax.random.split(key, 9)
    scale = 0.02
    wb = scale * jax.random.normal(ks[0], (in_dim, rep_dim), jnp.float32)
    bb = scale * jax.random.normal(ks[1], (1, rep_dim), jnp.float32)
    w1 = scale * jax.random.normal(ks[2], (feature_dim, hidden_dim), jnp.float32)
    b1 = scale * jax.random.normal(ks[3], (1, hidden_dim), jnp.float32)
    w2 = scale * jax.random.normal(ks[4], (hidden_dim, hidden_dim), jnp.float32)
    b2 = scale * jax.random.normal(ks[5], (1, hidden_dim), jnp.float32)
    # fc weight [rep_dim + hidden_dim, n_out], split into its two halves
    wr = scale * jax.random.normal(ks[6], (rep_dim, n_out), jnp.float32)
    wf = scale * jax.random.normal(ks[7], (hidden_dim, n_out), jnp.float32)
    bfc = scale * jax.random.normal(ks[8], (1, n_out), jnp.float32)
    return (wb, bb, w1, b1, w2, b2, wr, wf, bfc)


if __name__ == "__main__":
    # Small deterministic setup (use_features=True path).
    B, C, H, W = 2, 4, 16, 16
    feature_dim = 25
    hidden_dim = 25
    rep_dim = 32          # backbone.rep_dim
    in_dim = C * H * W    # 1024

    key = jax.random.PRNGKey(0)
    kx, kf, kp = jax.random.split(key, 3)
    x = jax.random.normal(kx, (B, C, H, W), jnp.float32)
    features = jax.random.normal(kf, (B, feature_dim), jnp.float32)
    params = make_params(kp, in_dim, rep_dim, feature_dim, hidden_dim)
    ref = _reference_forward(x, features, params)

    # Default prep: TK == in_dim -> single K step, backbone weight fetched
    # from HBM exactly once.
    prep = prepare_params(params)
    pred = jax.block_until_ready(model_wrapper_forward(x, features, prep))
    assert pred.shape == (B, 2)
    assert jnp.allclose(pred, ref, atol=2e-3, rtol=2e-3), (
        jnp.max(jnp.abs(pred - ref)))

    # Also exercise the K-tiled accumulation path (tk_max=512 -> 2 K steps).
    prep_tiled = prepare_params(params, tk_max=512)
    pred2 = jax.block_until_ready(model_wrapper_forward(x, features, prep_tiled))
    assert jnp.allclose(pred2, ref, atol=2e-3, rtol=2e-3), (
        jnp.max(jnp.abs(pred2 - ref)))

    print("KERNEL_OK")
</pallas_src>

<mosaic_0001>
module attributes {stable_mosaic.version = 11 : i64} {
  func.func @_wrapper_kernel(%arg0: i32, %arg1: i32, %arg2: memref<8x1024xf32, #tpu.memory_space<vmem>>, %arg3: memref<1024x32xbf16, #tpu.memory_space<vmem>>, %arg4: memref<1x32xf32, #tpu.memory_space<vmem>>, %arg5: memref<8x128xf32, #tpu.memory_space<vmem>>, %arg6: memref<128x128xf32, #tpu.memory_space<vmem>>, %arg7: memref<1x128xf32, #tpu.memory_space<vmem>>, %arg8: memref<128x128xf32, #tpu.memory_space<vmem>>, %arg9: memref<1x128xf32, #tpu.memory_space<vmem>>, %arg10: memref<32x128xf32, #tpu.memory_space<vmem>>, %arg11: memref<128x128xf32, #tpu.memory_space<vmem>>, %arg12: memref<1x128xf32, #tpu.memory_space<vmem>>, %arg13: memref<8x128xf32, #tpu.memory_space<vmem>>, %arg14: memref<8x32xf32, #tpu.memory_space<vmem>>) attributes {dimension_semantics = [#tpu.dimension_semantics<parallel>, #tpu.dimension_semantics<arbitrary>], iteration_bounds = array<i64: 1, 1>, scalar_prefetch = 0 : i64, scratch_operands = 1 : i64, tpu.core_type = #tpu.core_type<tc>, window_params = [{transform_indices = @transform_0, window_bounds = array<i64: 8, 1024>}, {transform_indices = @transform_1, window_bounds = array<i64: 1024, 32>}, {pipeline_mode = #tpu.pipeline_mode<synchronous>, transform_indices = @transform_2, window_bounds = array<i64: 1, 32>}, {transform_indices = @transform_3, window_bounds = array<i64: 8, 128>}, {pipeline_mode = #tpu.pipeline_mode<synchronous>, transform_indices = @transform_4, window_bounds = array<i64: 128, 128>}, {pipeline_mode = #tpu.pipeline_mode<synchronous>, transform_indices = @transform_5, window_bounds = array<i64: 1, 128>}, {pipeline_mode = #tpu.pipeline_mode<synchronous>, transform_indices = @transform_6, window_bounds = array<i64: 128, 128>}, {pipeline_mode = #tpu.pipeline_mode<synchronous>, transform_indices = @transform_7, window_bounds = array<i64: 1, 128>}, {pipeline_mode = #tpu.pipeline_mode<synchronous>, transform_indices = @transform_8, window_bounds = array<i64: 32, 128>}, {pipeline_mode = #tpu.pipeline_mode<synchronous>, transform_indices = @transform_9, window_bounds = array<i64: 128, 128>}, {pipeline_mode = #tpu.pipeline_mode<synchronous>, transform_indices = @transform_10, window_bounds = array<i64: 1, 128>}, {transform_indices = @transform_11, window_bounds = array<i64: 8, 128>}]} {
    %c0_i32 = arith.constant 0 : i32
    %0 = arith.cmpi eq, %arg1, %c0_i32 : i32
    %1 = arith.extui %0 : i1 to i32
    %c0_i32_0 = arith.constant 0 : i32
    %2 = arith.cmpi ne, %1, %c0_i32_0 : i32
    scf.if %2 {
      %cst_10 = arith.constant 0.000000e+00 : f32
      %13 = vector.broadcast %cst_10 : f32 to vector<8x32xf32>
      %c0_11 = arith.constant 0 : index
      %c0_12 = arith.constant 0 : index
      %14 = vector.load %arg14[%c0_11, %c0_12] : memref<8x32xf32, #tpu.memory_space<vmem>>, vector<8x32xf32>
      tpu.vector_store %arg14[%c0_11, %c0_12], %13 {strides = array<i32>} : memref<8x32xf32, #tpu.memory_space<vmem>>, vector<8x32xf32>,
    } else {
    }
    %c0 = arith.constant 0 : index
    %c0_1 = arith.constant 0 : index
    %3 = vector.load %arg14[%c0, %c0_1] : memref<8x32xf32, #tpu.memory_space<vmem>>, vector<8x32xf32>
    %c0_2 = arith.constant 0 : index
    %c0_3 = arith.constant 0 : index
    %4 = vector.load %arg2[%c0_2, %c0_3] : memref<8x1024xf32, #tpu.memory_space<vmem>>, vector<8x1024xf32>
    %5 = arith.truncf %4 : vector<8x1024xf32> to vector<8x1024xbf16>
    %c0_4 = arith.constant 0 : index
    %c0_5 = arith.constant 0 : index
    %6 = vector.load %arg3[%c0_4, %c0_5] : memref<1024x32xbf16, #tpu.memory_space<vmem>>, vector<1024x32xbf16>
    %cst = arith.constant dense<0.000000e+00> : vector<8x32xf32>
    %7 = tpu.matmul %5, %6, %cst {dimension_numbers = #tpu.dot_dimension_numbers<[1], [0], [0], [1], [0, 0, 1, 1], [], []>} : vector<8x1024xbf16>, vector<1024x32xbf16>, vector<8x32xf32> -> vector<8x32xf32>
    %8 = arith.addf %3, %7 : vector<8x32xf32>
    %c0_6 = arith.constant 0 : index
    %c0_7 = arith.constant 0 : index
    %9 = vector.load %arg14[%c0_6, %c0_7] : memref<8x32xf32, #tpu.memory_space<vmem>>, vector<8x32xf32>
    tpu.vector_store %arg14[%c0_6, %c0_7], %8 {strides = array<i32>} : memref<8x32xf32, #tpu.memory_space<vmem>>, vector<8x32xf32>,
    %c0_i32_8 = arith.constant 0 : i32
    %10 = arith.cmpi eq, %arg1, %c0_i32_8 : i32
    %11 = arith.extui %10 : i1 to i32
    %c0_i32_9 = arith.constant 0 : i32
    %12 = arith.cmpi ne, %11, %c0_i32_9 : i32
    scf.if %12 {
      %c0_10 = arith.constant 0 : index
      %c0_11 = arith.constant 0 : index
      %13 = vector.load %arg14[%c0_10, %c0_11] : memref<8x32xf32, #tpu.memory_space<vmem>>, vector<8x32xf32>
      %c0_12 = arith.constant 0 : index
      %c0_13 = arith.constant 0 : index
      %14 = vector.load %arg4[%c0_12, %c0_13] : memref<1x32xf32, #tpu.memory_space<vmem>>, vector<1x32xf32>
      %15 = vector.broadcast %14 : vector<1x32xf32> to vector<8x32xf32>
      %16 = arith.addf %13, %15 : vector<8x32xf32>
      %c0_14 = arith.constant 0 : index
      %c0_15 = arith.constant 0 : index
      %17 = vector.load %arg5[%c0_14, %c0_15] : memref<8x128xf32, #tpu.memory_space<vmem>>, vector<8x128xf32>
      %c0_16 = arith.constant 0 : index
      %c0_17 = arith.constant 0 : index
      %18 = vector.load %arg6[%c0_16, %c0_17] : memref<128x128xf32, #tpu.memory_space<vmem>>, vector<128x128xf32>
      %cst_18 = arith.constant dense<0.000000e+00> : vector<8x128xf32>
      %19 = tpu.matmul %17, %18, %cst_18 {dimension_numbers = #tpu.dot_dimension_numbers<[1], [0], [0], [1], [0, 0, 1, 1], [], []>} : vector<8x128xf32>, vector<128x128xf32>, vector<8x128xf32> -> vector<8x128xf32>
      %c0_19 = arith.constant 0 : index
      %c0_20 = arith.constant 0 : index
      %20 = vector.load %arg7[%c0_19, %c0_20] : memref<1x128xf32, #tpu.memory_space<vmem>>, vector<1x128xf32>
      %21 = vector.broadcast %20 : vector<1x128xf32> to vector<8x128xf32>
      %22 = arith.addf %19, %21 : vector<8x128xf32>
      %cst_21 = arith.constant 0.000000e+00 : f32
      %23 = vector.broadcast %cst_21 : f32 to vector<8x128xf32>
      %24 = arith.maximumf %22, %23 : vector<8x128xf32>
      %c0_22 = arith.constant 0 : index
      %c0_23 = arith.constant 0 : index
      %25 = vector.load %arg8[%c0_22, %c0_23] : memref<128x128xf32, #tpu.memory_space<vmem>>, vector<128x128xf32>
      %cst_24 = arith.constant dense<0.000000e+00> : vector<8x128xf32>
      %26 = tpu.matmul %24, %25, %cst_24 {dimension_numbers = #tpu.dot_dimension_numbers<[1], [0], [0], [1], [0, 0, 1, 1], [], []>} : vector<8x128xf32>, vector<128x128xf32>, vector<8x128xf32> -> vector<8x128xf32>
      %c0_25 = arith.constant 0 : index
      %c0_26 = arith.constant 0 : index
      %27 = vector.load %arg9[%c0_25, %c0_26] : memref<1x128xf32, #tpu.memory_space<vmem>>, vector<1x128xf32>
      %28 = vector.broadcast %27 : vector<1x128xf32> to vector<8x128xf32>
      %29 = arith.addf %26, %28 : vector<8x128xf32>
      %c0_27 = arith.constant 0 : index
      %c0_28 = arith.constant 0 : index
      %30 = vector.load %arg10[%c0_27, %c0_28] : memref<32x128xf32, #tpu.memory_space<vmem>>, vector<32x128xf32>
      %cst_29 = arith.constant dense<0.000000e+00> : vector<8x128xf32>
      %31 = tpu.matmul %16, %30, %cst_29 {dimension_numbers = #tpu.dot_dimension_numbers<[1], [0], [0], [1], [0, 0, 1, 1], [], []>} : vector<8x32xf32>, vector<32x128xf32>, vector<8x128xf32> -> vector<8x128xf32>
      %c0_30 = arith.constant 0 : index
      %c0_31 = arith.constant 0 : index
      %32 = vector.load %arg11[%c0_30, %c0_31] : memref<128x128xf32, #tpu.memory_space<vmem>>, vector<128x128xf32>
      %cst_32 = arith.constant dense<0.000000e+00> : vector<8x128xf32>
      %33 = tpu.matmul %29, %32, %cst_32 {dimension_numbers = #tpu.dot_dimension_numbers<[1], [0], [0], [1], [0, 0, 1, 1], [], []>} : vector<8x128xf32>, vector<128x128xf32>, vector<8x128xf32> -> vector<8x128xf32>
      %34 = arith.addf %31, %33 : vector<8x128xf32>
      %c0_33 = arith.constant 0 : index
      %c0_34 = arith.constant 0 : index
      %35 = vector.load %arg12[%c0_33, %c0_34] : memref<1x128xf32, #tpu.memory_space<vmem>>, vector<1x128xf32>
      %36 = vector.broadcast %35 : vector<1x128xf32> to vector<8x128xf32>
      %37 = arith.addf %34, %36 : vector<8x128xf32>
      %c0_35 = arith.constant 0 : index
      %c0_36 = arith.constant 0 : index
      %38 = vector.load %arg13[%c0_35, %c0_36] : memref<8x128xf32, #tpu.memory_space<vmem>>, vector<8x128xf32>
      tpu.vector_store %arg13[%c0_35, %c0_36], %37 {strides = array<i32>} : memref<8x128xf32, #tpu.memory_space<vmem>>, vector<8x128xf32>,
    } else {
    }
    return
  }
  func.func @transform_0(%arg0: i32, %arg1: i32) -> (i32, i32) {
    %c0_i32 = arith.constant 0 : i32
    return %arg0, %arg1 : i32, i32
  }
  func.func @transform_1(%arg0: i32, %arg1: i32) -> (i32, i32) {
    %c0_i32 = arith.constant 0 : i32
    %c0_i32_0 = arith.constant 0 : i32
    return %arg1, %c0_i32 : i32, i32
  }
  func.func @transform_2(%arg0: i32, %arg1: i32) -> (i32, i32) {
    %c0_i32 = arith.constant 0 : i32
    %c0_i32_0 = arith.constant 0 : i32
    %c0_i32_1 = arith.constant 0 : i32
    return %c0_i32, %c0_i32_0 : i32, i32
  }
  func.func @transform_3(%arg0: i32, %arg1: i32) -> (i32, i32) {
    %c0_i32 = arith.constant 0 : i32
    %c0_i32_0 = arith.constant 0 : i32
    return %arg0, %c0_i32 : i32, i32
  }
  func.func @transform_4(%arg0: i32, %arg1: i32) -> (i32, i32) {
    %c0_i32 = arith.constant 0 : i32
    %c0_i32_0 = arith.constant 0 : i32
    %c0_i32_1 = arith.constant 0 : i32
    return %c0_i32, %c0_i32_0 : i32, i32
  }
  func.func @transform_5(%arg0: i32, %arg1: i32) -> (i32, i32) {
    %c0_i32 = arith.constant 0 : i32
    %c0_i32_0 = arith.constant 0 : i32
    %c0_i32_1 = arith.constant 0 : i32
    return %c0_i32, %c0_i32_0 : i32, i32
  }
  func.func @transform_6(%arg0: i32, %arg1: i32) -> (i32, i32) {
    %c0_i32 = arith.constant 0 : i32
    %c0_i32_0 = arith.constant 0 : i32
    %c0_i32_1 = arith.constant 0 : i32
    return %c0_i32, %c0_i32_0 : i32, i32
  }
  func.func @transform_7(%arg0: i32, %arg1: i32) -> (i32, i32) {
    %c0_i32 = arith.constant 0 : i32
    %c0_i32_0 = arith.constant 0 : i32
    %c0_i32_1 = arith.constant 0 : i32
    return %c0_i32, %c0_i32_0 : i32, i32
  }
  func.func @transform_8(%arg0: i32, %arg1: i32) -> (i32, i32) {
    %c0_i32 = arith.constant 0 : i32
    %c0_i32_0 = arith.constant 0 : i32
    %c0_i32_1 = arith.constant 0 : i32
    return %c0_i32, %c0_i32_0 : i32, i32
  }
  func.func @transform_9(%arg0: i32, %arg1: i32) -> (i32, i32) {
    %c0_i32 = arith.constant 0 : i32
    %c0_i32_0 = arith.constant 0 : i32
    %c0_i32_1 = arith.constant 0 : i32
    return %c0_i32, %c0_i32_0 : i32, i32
  }
  func.func @transform_10(%arg0: i32, %arg1: i32) -> (i32, i32) {
    %c0_i32 = arith.constant 0 : i32
    %c0_i32_0 = arith.constant 0 : i32
    %c0_i32_1 = arith.constant 0 : i32
    return %c0_i32, %c0_i32_0 : i32, i32
  }
  func.func @transform_11(%arg0: i32, %arg1: i32) -> (i32, i32) {
    %c0_i32 = arith.constant 0 : i32
    %c0_i32_0 = arith.constant 0 : i32
    return %arg0, %c0_i32 : i32, i32
  }
}

</mosaic_0001>

<bundles_post_ra>
// kernel: tpu_custom_call.1
= control target key start
LH: loop header
LB: loop body
LE: loop exit
PB: predicated region body
PF: predicated region fallthrough
CT: control target
= control target key end

     0   :  { %vm1624_vm0 = vmmov 0   ;;  %s2124_s0 = inlined_call_operand.vmem [shape: f32[8,1024], index: 0, kind: input, shape index: {}]   ;;  %s2125_s1 = inlined_call_operand.vmem [shape: bf16[1024,32], index: 1, kind: input, shape index: {}]   ;;  %s2126_s2 = inlined_call_operand.vmem [shape: f32[1,32], index: 2, kind: input, shape index: {}]   ;;  %s2127_s3 = inlined_call_operand.vmem [shape: f32[8,128], index: 3, kind: input, shape index: {}]   ;;  %s2128_s4 = inlined_call_operand.vmem [shape: f32[128,128], index: 4, kind: input, shape index: {}]   ;;  %s2129_s5 = inlined_call_operand.vmem [shape: f32[1,128], index: 5, kind: input, shape index: {}]   ;;  %s2130_s6 = inlined_call_operand.vmem [shape: f32[128,128], index: 6, kind: input, shape index: {}]   ;;  %s2131_s7 = inlined_call_operand.vmem [shape: f32[1,128], index: 7, kind: input, shape index: {}]   ;;  %s2132_s8 = inlined_call_operand.vmem [shape: f32[32,128], index: 8, kind: input, shape index: {}]   ;;  %s2133_s9 = inlined_call_operand.vmem [shape: f32[128,128], index: 9, kind: input, shape index: {}]   ;;  %s2134_s10 = inlined_call_operand.vmem [shape: f32[1,128], index: 10, kind: input, shape index: {}]   ;;  %s2135_s11 = inlined_call_operand.hbm [shape: f32[8,128], index: 11, kind: output, shape index: {}]  }
   0x1   :  { %v1535_v0 = vld [vmem:[%s2125_s1 + $0x40] sm:$0xff]   ;;  %v1539_v4 = vld [vmem:[%s2125_s1 + $0x48] sm:$0xff]   ;;  %v1543_v8 = vld [vmem:[%s2125_s1 + $0x50] sm:$0xff]  }
   0x2   :  { %v1536_v1 = vld [vmem:[%s2125_s1 + $0xc0] sm:$0xff]   ;;  %1193 = vmatprep.subr.bf16.mxu0 %v1535_v0  ;;  %v1540_v5 = vld [vmem:[%s2125_s1 + $0xc8] sm:$0xff]   ;;  %v1544_v9 = vld [vmem:[%s2125_s1 + $0xd0] sm:$0xff]  }
   0x3   :  { %v1537_v2 = vld [vmem:[%s2125_s1] sm:$0xff]   ;;  %1215 = vmatprep.subr.bf16.mxu1 %v1536_v1  ;;  %v1541_v6 = vld [vmem:[%s2125_s1 + $0x8] sm:$0xff]   ;;  %v1545_v10 = vld [vmem:[%s2125_s1 + $0x10] sm:$0xff]  }
   0x4   :  { %v1538_v3 = vld [vmem:[%s2125_s1 + $0x80] sm:$0xff]   ;;  %1194 = vmatpush3.bf16.msra.mxu0 %v1537_v2  ;;  %v1542_v7 = vld [vmem:[%s2125_s1 + $0x88] sm:$0xff]   ;;  %v1546_v11 = vld [vmem:[%s2125_s1 + $0x90] sm:$0xff]  }
   0x5   :  { %1216 = vmatpush3.bf16.msra.mxu1 %v1538_v3  ;;  %1195 = vmatprep.subr.bf16.mxu0 %v1539_v4  ;;  %v1547_v12 = vld [vmem:[%s2125_s1 + $0x58] sm:$0xff]   ;;  %v1551_v16 = vld [vmem:[%s2125_s1 + $0x60] sm:$0xff]   ;;  %v1555_v20 = vld [vmem:[%s2125_s1 + $0x68] sm:$0xff]  }
   0x6   :  { %1217 = vmatprep.subr.bf16.mxu1 %v1540_v5  ;;  %v1548_v13 = vld [vmem:[%s2125_s1 + $0xd8] sm:$0xff]   ;;  %v1552_v17 = vld [vmem:[%s2125_s1 + $0xe0] sm:$0xff]   ;;  %v1556_v21 = vld [vmem:[%s2125_s1 + $0xe8] sm:$0xff]  }
   0x7   :  { %v1549_v14 = vld [vmem:[%s2125_s1 + $0x18] sm:$0xff]   ;;  %v1553_v18 = vld [vmem:[%s2125_s1 + $0x20] sm:$0xff]   ;;  %v1557_v22 = vld [vmem:[%s2125_s1 + $0x28] sm:$0xff]  }
   0x8   :  { %1196 = vmatpush3.bf16.msra.mxu0 %v1541_v6  ;;  %v1550_v15 = vld [vmem:[%s2125_s1 + $0x98] sm:$0xff]   ;;  %v1554_v19 = vld [vmem:[%s2125_s1 + $0xa0] sm:$0xff]   ;;  %v1558_v23 = vld [vmem:[%s2125_s1 + $0xa8] sm:$0xff]  }
   0x9   :  { %1218 = vmatpush3.bf16.msra.mxu1 %v1542_v7  ;;  %1197 = vmatprep.subr.bf16.mxu0 %v1543_v8  ;;  %v1559_v24 = vld [vmem:[%s2125_s1 + $0x70] sm:$0xff]   ;;  %v1563_v28 = vld [vmem:[%s2125_s1 + $0x78] sm:$0xff]   ;;  %v48_v32 = vld [vmem:[%s2124_s0 + $0x8] sm:$0xff] }
   0xa   :  { %1219 = vmatprep.subr.bf16.mxu1 %v1544_v9  ;;  %v1560_v25 = vld [vmem:[%s2125_s1 + $0xf0] sm:$0xff]   ;;  %v1564_v29 = vld [vmem:[%s2125_s1 + $0xf8] sm:$0xff]   ;;  %v47_v34 = vld [vmem:[%s2124_s0] sm:$0xff]  ;;  %v56_v35 = vpack.c.bf16 %v48_v32, %v48_v32 }
   0xb   :  { %v1561_v26 = vld [vmem:[%s2125_s1 + $0x30] sm:$0xff]   ;;  %v1565_v30 = vld [vmem:[%s2125_s1 + $0x38] sm:$0xff]   ;;  %v55_v37 = vpack.c.bf16 %v47_v34, %v47_v34  ;;  %v1567_v40 = vld [vmem:[%s2125_s1 + $0x140] sm:$0xff]  }
   0xc   :  { %1198 = vmatpush3.bf16.msra.mxu0 %v1545_v10  ;;  %v1562_v27 = vld [vmem:[%s2125_s1 + $0xb0] sm:$0xff]   ;;  %v1566_v31 = vld [vmem:[%s2125_s1 + $0xb8] sm:$0xff]   ;;  %607 = vmatprep.mubr.bf16.mxu0 %v56_v35  ;;  %v1568_v41 = vld [vmem:[%s2125_s1 + $0x100] sm:$0xff]  }
   0xd   :  { %1220 = vmatpush3.bf16.msra.mxu1 %v1546_v11  ;;  %1199 = vmatprep.subr.bf16.mxu0 %v1547_v12  ;;  %v50_v33 = vld [vmem:[%s2124_s0 + $0x18] sm:$0xff]  ;;  %v49_v38 = vld [vmem:[%s2124_s0 + $0x10] sm:$0xff]  ;;  %v1569_v42 = vld [vmem:[%s2125_s1 + $0x1c0] sm:$0xff]  }
   0xe   :  { %1221 = vmatprep.subr.bf16.mxu1 %v1548_v13  ;;  %v58_v36 = vpack.c.bf16 %v50_v33, %v50_v33  ;;  %v57_v39 = vpack.c.bf16 %v49_v38, %v49_v38  ;;  %v1570_v43 = vld [vmem:[%s2125_s1 + $0x180] sm:$0xff]   ;;  %v1571_v44 = vld [vmem:[%s2125_s1 + $0x148] sm:$0xff]   ;;  %v1575_v48 = vld [vmem:[%s2125_s1 + $0x150] sm:$0xff]  }
   0xf   :  { %v1572_v45 = vld [vmem:[%s2125_s1 + $0x108] sm:$0xff]   ;;  %v1576_v49 = vld [vmem:[%s2125_s1 + $0x110] sm:$0xff]   ;;  %v1579_v52 = vld [vmem:[%s2125_s1 + $0x158] sm:$0xff]  }
  0x10   :  { %1200 = vmatpush3.bf16.msra.mxu0 %v1549_v14  ;;  %647 = vmatprep.mubr.bf16.mxu1 %v58_v36  ;;  %v1573_v46 = vld [vmem:[%s2125_s1 + $0x1c8] sm:$0xff]   ;;  %v1577_v50 = vld [vmem:[%s2125_s1 + $0x1d0] sm:$0xff]   ;;  %v1580_v53 = vld [vmem:[%s2125_s1 + $0x118] sm:$0xff]  }
  0x11   :  { %1222 = vmatpush3.bf16.msra.mxu1 %v1550_v15  ;;  %1201 = vmatprep.subr.bf16.mxu0 %v1551_v16  ;;  %v1574_v47 = vld [vmem:[%s2125_s1 + $0x188] sm:$0xff]   ;;  %v1578_v51 = vld [vmem:[%s2125_s1 + $0x190] sm:$0xff]   ;;  %v1581_v54 = vld [vmem:[%s2125_s1 + $0x1d8] sm:$0xff]  }
  0x12   :  { %1223 = vmatprep.subr.bf16.mxu1 %v1552_v17  ;;  %v1582_v55 = vld [vmem:[%s2125_s1 + $0x198] sm:$0xff]   ;;  %v1583_v56 = vld [vmem:[%s2125_s1 + $0x160] sm:$0xff]   ;;  %v1587_v60 = vld [vmem:[%s2125_s1 + $0x168] sm:$0xff]  }
  0x13   :  { %v1584_v57 = vld [vmem:[%s2125_s1 + $0x120] sm:$0xff]   ;;  %v1588_v61 = vld [vmem:[%s2125_s1 + $0x128] sm:$0xff]   ;;  %v1591_v0 = vld [vmem:[%s2125_s1 + $0x170] sm:$0xff]  }
  0x14   :  { %1202 = vmatpush3.bf16.msra.mxu0 %v1553_v18  ;;  %v1585_v58 = vld [vmem:[%s2125_s1 + $0x1e0] sm:$0xff]   ;;  %v1589_v62 = vld [vmem:[%s2125_s1 + $0x1e8] sm:$0xff]   ;;  %v1592_v1 = vld [vmem:[%s2125_s1 + $0x130] sm:$0xff]  }
  0x15   :  { %1224 = vmatpush3.bf16.msra.mxu1 %v1554_v19  ;;  %1203 = vmatprep.subr.bf16.mxu0 %v1555_v20  ;;  %v1586_v59 = vld [vmem:[%s2125_s1 + $0x1a0] sm:$0xff]   ;;  %v1590_v63 = vld [vmem:[%s2125_s1 + $0x1a8] sm:$0xff]   ;;  %v1593_v2 = vld [vmem:[%s2125_s1 + $0x1f0] sm:$0xff]   ;;  %v1623_v20 = vmov 0.0|0.0  }
  0x16   :  { %1225 = vmatprep.subr.bf16.mxu1 %v1556_v21  ;;  %v1594_v3 = vld [vmem:[%s2125_s1 + $0x1b0] sm:$0xff]   ;;  %v1595_v4 = vld [vmem:[%s2125_s1 + $0x178] sm:$0xff]   ;;  %v52_v7 = vld [vmem:[%s2124_s0 + $0x28] sm:$0xff] }
  0x17   :  { %v1596_v5 = vld [vmem:[%s2125_s1 + $0x138] sm:$0xff]   ;;  %v60_v8 = vpack.c.bf16 %v52_v7, %v52_v7  ;;  %v51_v10 = vld [vmem:[%s2124_s0 + $0x20] sm:$0xff]  ;;  %v752_v14 = vld [vmem:[%s2128_s4 + $0x8] sm:$0xff] }
  0x18   :  { %1204 = vmatpush3.bf16.msra.mxu0 %v1557_v22  ;;  %v1597_v6 = vld [vmem:[%s2125_s1 + $0x1f8] sm:$0xff]   ;;  %v59_v11 = vpack.c.bf16 %v51_v10, %v51_v10  ;;  %v751_v13 = vld [vmem:[%s2128_s4] sm:$0xff]  ;;  %v53_v17 = vld [vmem:[%s2124_s0 + $0x30] sm:$0xff] }
  0x19   :  { %1226 = vmatpush3.bf16.msra.mxu1 %v1558_v23  ;;  %1205 = vmatprep.subr.bf16.mxu0 %v1559_v24  ;;  %v1598_v9 = vld [vmem:[%s2125_s1 + $0x1b8] sm:$0xff]   ;;  %v1454_v16 = vpack.c.bf16 %v752_v14, %v751_v13  ;;  %v753_v18 = vld [vmem:[%s2128_s4 + $0x10] sm:$0xff]  ;;  %v61_v21 = vpack.c.bf16 %v53_v17, %v53_v17  ;;  %v755_v23 = vld [vmem:[%s2128_s4 + $0x20] sm:$0xff] }
  0x1a   :  { %1227 = vmatprep.subr.bf16.mxu1 %v1560_v25  ;;  %v54_v12 = vld [vmem:[%s2124_s0 + $0x38] sm:$0xff]  ;;  %v756_v24 = vld [vmem:[%s2128_s4 + $0x28] sm:$0xff]  ;;  %v1625_v25 = vmov 0.0  }
  0x1b   :  { %v62_v15 = vpack.c.bf16 %v54_v12, %v54_v12  ;;  %v754_v19 = vld [vmem:[%s2128_s4 + $0x18] sm:$0xff] }
  0x1c   :  { %1206 = vmatpush3.bf16.msra.mxu0 %v1561_v26  ;;  %v1457_v22 = vpack.c.bf16 %v754_v19, %v753_v18 }
  0x1d   :  { %1228 = vmatpush3.bf16.msra.mxu1 %v1562_v27  ;;  %1207 = vmatprep.subr.bf16.mxu0 %v1563_v28 }
  0x1e   :  { %1229 = vmatprep.subr.bf16.mxu1 %v1564_v29 }
  0x20   :  { %1208 = vmatpush3.bf16.msra.mxu0 %v1565_v30 }
  0x21   :  { %1230 = vmatpush3.bf16.msra.mxu1 %v1566_v31  ;;  %1237 = vmatprep.subr.bf16.mxu0 %v1567_v40 }
  0x22   :  { %1259 = vmatprep.subr.bf16.mxu1 %v1569_v42 }
  0x23   :  { %608 = vmatmul.mubr.bf16.vlgmr.msra.gmra.mrb[0].mxu0 %v55_v37 }
  0x24   :  { %648 = vmatmul.mubr.bf16.vlgmr.msra.gmra.mrb[0].mxu1 %v57_v39  ;;  %1238 = vmatpush3.bf16.msra.mxu0 %v1568_v41 }
  0x25   :  { %1260 = vmatpush3.bf16.msra.mxu1 %v1570_v43  ;;  %1239 = vmatprep.subr.bf16.mxu0 %v1571_v44 }
  0x26   :  { %1261 = vmatprep.subr.bf16.mxu1 %v1573_v46  ;;  %687 = vmatprep.mubr.bf16.mxu0 %v60_v8 }
  0x27   :  { %727 = vmatprep.mubr.bf16.mxu1 %v62_v15 }
  0x28   :  { %1240 = vmatpush3.bf16.msra.mxu0 %v1572_v45 }
  0x29   :  { %1262 = vmatpush3.bf16.msra.mxu1 %v1574_v47  ;;  %1241 = vmatprep.subr.bf16.mxu0 %v1575_v48 }
  0x2a   :  { %1263 = vmatprep.subr.bf16.mxu1 %v1577_v50 }
  0x2c   :  { %1242 = vmatpush3.bf16.msra.mxu0 %v1576_v49 }
  0x2d   :  { %1264 = vmatpush3.bf16.msra.mxu1 %v1578_v51  ;;  %1243 = vmatprep.subr.bf16.mxu0 %v1579_v52 }
  0x2e   :  { %1265 = vmatprep.subr.bf16.mxu1 %v1581_v54 }
  0x30   :  { %1244 = vmatpush3.bf16.msra.mxu0 %v1580_v53 }
  0x31   :  { %1266 = vmatpush3.bf16.msra.mxu1 %v1582_v55  ;;  %1245 = vmatprep.subr.bf16.mxu0 %v1583_v56 }
  0x32   :  { %1267 = vmatprep.subr.bf16.mxu1 %v1585_v58 }
  0x34   :  { %1246 = vmatpush3.bf16.msra.mxu0 %v1584_v57 }
  0x35   :  { %1268 = vmatpush3.bf16.msra.mxu1 %v1586_v59  ;;  %1247 = vmatprep.subr.bf16.mxu0 %v1587_v60 }
  0x36   :  { %1269 = vmatprep.subr.bf16.mxu1 %v1589_v62 }
  0x38   :  { %1248 = vmatpush3.bf16.msra.mxu0 %v1588_v61 }
  0x39   :  { %1270 = vmatpush3.bf16.msra.mxu1 %v1590_v63  ;;  %1249 = vmatprep.subr.bf16.mxu0 %v1591_v0 }
  0x3a   :  { %1271 = vmatprep.subr.bf16.mxu1 %v1593_v2 }
  0x3c   :  { %1250 = vmatpush3.bf16.msra.mxu0 %v1592_v1 }
  0x3d   :  { %1272 = vmatpush3.bf16.msra.mxu1 %v1594_v3  ;;  %1251 = vmatprep.subr.bf16.mxu0 %v1595_v4 }
  0x3e   :  { %1273 = vmatprep.subr.bf16.mxu1 %v1597_v6 }
  0x40   :  { %1252 = vmatpush3.bf16.msra.mxu0 %v1596_v5 }
  0x41   :  { %1274 = vmatpush3.bf16.msra.mxu1 %v1598_v9  ;;  %1453 = vmatprep.subr.bf16.mxu0 %v1623_v20 }
  0x42   :  { %1477 = vmatprep.subr.bf16.mxu1 %v1623_v20 }
  0x43   :  { %688 = vmatmul.mubr.bf16.vlgmr.msra.gmra.mrb[4].mxu0 %v59_v11 }
  0x44   :  { %1455 = vmatpush3.bf16.msra.mxu0 %v1454_v16  ;;  %728 = vmatmul.mubr.bf16.vlgmr.msra.gmra.mrb[4].mxu1 %v61_v21 }
  0x45   :  { %1456 = vmatprep.subr.bf16.mxu0 %v1623_v20  ;;  %1369 = vmatprep.mubr.msk.f32.mxu0 %vm1624_vm0, %v1625_v25 }
  0x46   :  { %1404 = vmatprep.mubr.msk.f32.mxu1 %vm1624_vm0, %v1625_v25 }
  0x47   :  { %16 = vsyncpa [#allocation4], 0  ;;  %v1460_v26 = vpack.c.bf16 %v756_v24, %v755_v23  ;;  %v757_v27 = vld [vmem:[%s2128_s4 + $0x30] sm:$0xff]  ;;  %v758_v28 = vld [vmem:[%s2128_s4 + $0x38] sm:$0xff]  ;;  %vm44_vm1 = vcmask 261120   ;;  %s1626_s24 = smov [#allocation3]  }
  0x48   :  { %1458 = vmatpush3.bf16.msra.mxu0 %v1457_v22  ;;  %v1463_v29 = vpack.c.bf16 %v758_v28, %v757_v27  ;;  %v759_v30 = vld [vmem:[%s2128_s4 + $0x40] sm:$0xff]  ;;  %v760_v31 = vld [vmem:[%s2128_s4 + $0x48] sm:$0xff]  ;;  %v761_v33 = vld [vmem:[%s2128_s4 + $0x50] sm:$0xff]  ;;  %45 = vst.msk [vmem:[#allocation2] sm:$0xff] %vm44_vm1, %v1625_v25  ;;  %s1116_s25 = sshll.u32 %s1626_s24, 4  ;;  %s1117_s25 = int_to_ptr.vmem [resolvable:$true] %s1116_s25 }
  0x49   :  { %1459 = vmatprep.subr.bf16.mxu0 %v1623_v20  ;;  %v1466_v32 = vpack.c.bf16 %v760_v31, %v759_v30  ;;  %v762_v34 = vld [vmem:[%s2128_s4 + $0x58] sm:$0xff]  ;;  %v763_v36 = vld [vmem:[%s2128_s4 + $0x60] sm:$0xff]  ;;  %v764_v37 = vld [vmem:[%s2128_s4 + $0x68] sm:$0xff]  ;;  %p1604_p1 = scmp.lt.s32.totalorder %s1117_s25, %s1117_s25 }
  0x4a   :  { %v1469_v35 = vpack.c.bf16 %v762_v34, %v761_v33  ;;  %v1472_v38 = vpack.c.bf16 %v764_v37, %v763_v36  ;;  %v765_v39 = vld [vmem:[%s2128_s4 + $0x70] sm:$0xff]  ;;  %v766_v40 = vld [vmem:[%s2128_s4 + $0x78] sm:$0xff]  ;;  %v750_v42 = vld [vmem:[%s2127_s3] sm:$0xff] }
  0x4b   :  { %v1475_v41 = vpack.c.bf16 %v766_v40, %v765_v39  ;;  %v845_v43 = vld [vmem:[%s2130_s6] sm:$0xff]  ;;  %v846_v44 = vld [vmem:[%s2130_s6 + $0x8] sm:$0xff]  ;;  %v847_v46 = vld [vmem:[%s2130_s6 + $0x10] sm:$0xff] }
  0x4c   :  { %1461 = vmatpush3.bf16.msra.mxu0 %v1460_v26  ;;  %v1478_v45 = vpack.c.bf16 %v846_v44, %v845_v43  ;;  %v848_v47 = vld [vmem:[%s2130_s6 + $0x18] sm:$0xff]  ;;  %v849_v49 = vld [vmem:[%s2130_s6 + $0x20] sm:$0xff]  ;;  %v850_v50 = vld [vmem:[%s2130_s6 + $0x28] sm:$0xff] }
  0x4d   :  { %1462 = vmatprep.subr.bf16.mxu0 %v1623_v20  ;;  %v1481_v48 = vpack.c.bf16 %v848_v47, %v847_v46  ;;  %v851_v51 = vld [vmem:[%s2130_s6 + $0x30] sm:$0xff]  ;;  %v1484_v52 = vpack.c.bf16 %v850_v50, %v849_v49  ;;  %v852_v53 = vld [vmem:[%s2130_s6 + $0x38] sm:$0xff]  ;;  %v853_v55 = vld [vmem:[%s2130_s6 + $0x40] sm:$0xff] }
  0x4e   :  { %1479 = vmatpush3.bf16.msra.mxu1 %v1478_v45  ;;  %v1487_v54 = vpack.c.bf16 %v852_v53, %v851_v51  ;;  %v854_v56 = vld [vmem:[%s2130_s6 + $0x48] sm:$0xff]  ;;  %v855_v58 = vld [vmem:[%s2130_s6 + $0x50] sm:$0xff]  ;;  %v856_v59 = vld [vmem:[%s2130_s6 + $0x58] sm:$0xff] }
  0x4f   :  { %1480 = vmatprep.subr.bf16.mxu1 %v1623_v20  ;;  %v1490_v57 = vpack.c.bf16 %v854_v56, %v853_v55  ;;  %v1493_v60 = vpack.c.bf16 %v856_v59, %v855_v58  ;;  %v857_v61 = vld [vmem:[%s2130_s6 + $0x60] sm:$0xff]  ;;  %v858_v62 = vld [vmem:[%s2130_s6 + $0x68] sm:$0xff]  ;;  %v859_v0 = vld [vmem:[%s2130_s6 + $0x70] sm:$0xff] }
  0x50   :  { %1464 = vmatpush3.bf16.msra.mxu0 %v1463_v29  ;;  %v1496_v63 = vpack.c.bf16 %v858_v62, %v857_v61  ;;  %v860_v1 = vld [vmem:[%s2130_s6 + $0x78] sm:$0xff]  ;;  %v942_v3 = vld [vmem:[%s2133_s9] sm:$0xff]  ;;  %v943_v4 = vld [vmem:[%s2133_s9 + $0x8] sm:$0xff] }
  0x51   :  { %1465 = vmatprep.subr.bf16.mxu0 %v1623_v20  ;;  %v1499_v2 = vpack.c.bf16 %v860_v1, %v859_v0  ;;  %v944_v5 = vld [vmem:[%s2133_s9 + $0x10] sm:$0xff]  ;;  %v1502_v6 = vpack.c.bf16 %v943_v4, %v942_v3  ;;  %v945_v7 = vld [vmem:[%s2133_s9 + $0x18] sm:$0xff]  ;;  %v946_v9 = vld [vmem:[%s2133_s9 + $0x20] sm:$0xff] }
  0x52   :  { %1482 = vmatpush3.bf16.msra.mxu1 %v1481_v48  ;;  %v1505_v8 = vpack.c.bf16 %v945_v7, %v944_v5  ;;  %v947_v10 = vld [vmem:[%s2133_s9 + $0x28] sm:$0xff]  ;;  %v948_v12 = vld [vmem:[%s2133_s9 + $0x30] sm:$0xff]  ;;  %v949_v13 = vld [vmem:[%s2133_s9 + $0x38] sm:$0xff] }
  0x53   :  { %1483 = vmatprep.subr.bf16.mxu1 %v1623_v20  ;;  %v1508_v11 = vpack.c.bf16 %v947_v10, %v946_v9  ;;  %v1511_v14 = vpack.c.bf16 %v949_v13, %v948_v12  ;;  %v950_v15 = vld [vmem:[%s2133_s9 + $0x40] sm:$0xff]  ;;  %v951_v16 = vld [vmem:[%s2133_s9 + $0x48] sm:$0xff]  ;;  %v952_v18 = vld [vmem:[%s2133_s9 + $0x50] sm:$0xff] }
  0x54   :  { %1467 = vmatpush3.bf16.msra.mxu0 %v1466_v32  ;;  %v1514_v17 = vpack.c.bf16 %v951_v16, %v950_v15  ;;  %v953_v19 = vld [vmem:[%s2133_s9 + $0x58] sm:$0xff]  ;;  %v954_v22 = vld [vmem:[%s2133_s9 + $0x60] sm:$0xff]  ;;  %v955_v23 = vld [vmem:[%s2133_s9 + $0x68] sm:$0xff] }
  0x55   :  { %1468 = vmatprep.subr.bf16.mxu0 %v1623_v20  ;;  %v1517_v21 = vpack.c.bf16 %v953_v19, %v952_v18  ;;  %v1520_v24 = vpack.c.bf16 %v955_v23, %v954_v22  ;;  %v46_v48 = vld [vmem:[#allocation2] sm:$0xff]  ;;  %v939_v53 = vld [vmem:[%s2132_s8 + $0x8] sm:$0xff]  ;;  %v940_v59 = vld [vmem:[%s2132_s8 + $0x10] sm:$0xff] }
  0x56   :  { %1485 = vmatpush3.bf16.msra.mxu1 %v1484_v52  ;;  %v1189_v51 = vld [vmem:[%s2129_s5] ss:$0 sm:$0xff]  ;;  %v956_v1 = vld [vmem:[%s2133_s9 + $0x70] sm:$0xff] }
  0x57   :  { %1486 = vmatprep.subr.bf16.mxu1 %v1623_v20  ;;  %v938_v52 = vld [vmem:[%s2132_s8] sm:$0xff] }
  0x58   :  { %1470 = vmatpush3.bf16.msra.mxu0 %v1469_v35  ;;  %v1192_v9 = vld [vmem:[%s2134_s10] ss:$0 sm:$0xff] }
  0x59   :  { %1471 = vmatprep.subr.bf16.mxu0 %v1623_v20 }
  0x5a   :  { %1488 = vmatpush3.bf16.msra.mxu1 %v1487_v54 }
  0x5b   :  { %1489 = vmatprep.subr.bf16.mxu1 %v1623_v20 }
  0x5c   :  { %1473 = vmatpush3.bf16.msra.mxu0 %v1472_v38 }
  0x5d   :  { %1474 = vmatprep.subr.bf16.mxu0 %v1623_v20 }
  0x5e   :  { %1491 = vmatpush3.bf16.msra.mxu1 %v1490_v57  ;;  %v1526_v57 = vpack.c.bf16 %v939_v53, %v938_v52 }
  0x5f   :  { %1492 = vmatprep.subr.bf16.mxu1 %v1623_v20 }
  0x60   :  { %1476 = vmatpush3.bf16.msra.mxu0 %v1475_v41 }
  0x61   :  { %1501 = vmatprep.subr.bf16.mxu0 %v1623_v20 }
  0x62   :  { %1494 = vmatpush3.bf16.msra.mxu1 %v1493_v60  ;;  %v941_v60 = vld [vmem:[%s2132_s8 + $0x18] sm:$0xff] }
  0x63   :  { %1370 = vmatmul.mubr.f32.vlgmr.msra.gmra.mrb[8].mxu0 %v750_v42  ;;  %1495 = vmatprep.subr.bf16.mxu1 %v1623_v20  ;;  %v1529_v61 = vpack.c.bf16 %v941_v60, %v940_v59 }
  0x64   :  { %1439 = vmatprep.mubr.msk.f32.mxu0 %vm1624_vm0, %v1625_v25  ;;  %1503 = vmatpush3.bf16.msra.mxu0 %v1502_v6 }
  0x65   :  { %1504 = vmatprep.subr.bf16.mxu0 %v1623_v20 }
  0x66   :  { %1497 = vmatpush3.bf16.msra.mxu1 %v1496_v63  ;;  %v1188_v63 = vld [vmem:[%s2126_s2] ss:$0 sm:$0xff] }
  0x67   :  { %1498 = vmatprep.subr.bf16.mxu1 %v1623_v20 }
  0x68   :  { %1506 = vmatpush3.bf16.msra.mxu0 %v1505_v8 }
  0x69   :  { %1507 = vmatprep.subr.bf16.mxu0 %v1623_v20 }
  0x6a   :  { %1500 = vmatpush3.bf16.msra.mxu1 %v1499_v2  ;;  %v957_v2 = vld [vmem:[%s2133_s9 + $0x78] sm:$0xff]  ;;  %s1599_s9 = scalar_lea.vmem %s1117_s25, 128 }
  0x6b   :  { %1525 = vmatprep.subr.bf16.mxu1 %v1623_v20  ;;  %p1600_p0 = scmp.ne.s32.totalorder %s1117_s25, %s1599_s9  ;;  %p1605_p2 = scmp.lt.s32.totalorder %s1599_s9, %s1599_s9 }
  0x6c   :  { %1509 = vmatpush3.bf16.msra.mxu0 %v1508_v11 }
  0x6d   :  { %1510 = vmatprep.subr.bf16.mxu0 %v1623_v20  ;;  %p1606_p3 = por %p1605_p2, %p1604_p1 }
  0x6f   :  { %p1607_p4 = pnand %p1606_p3, %p1600_p0 }
  0x70   :  { %1512 = vmatpush3.bf16.msra.mxu0 %v1511_v14 }
  0x71   :  { %1513 = vmatprep.subr.bf16.mxu0 %v1623_v20 }
  0x74   :  { %1515 = vmatpush3.bf16.msra.mxu0 %v1514_v17 }
  0x75   :  { %1516 = vmatprep.subr.bf16.mxu0 %v1623_v20 }
  0x78   :  { %1518 = vmatpush3.bf16.msra.mxu0 %v1517_v21 }
  0x79   :  { %1519 = vmatprep.subr.bf16.mxu0 %v1623_v20 }
  0x7c   :  { %1521 = vmatpush3.bf16.msra.mxu0 %v1520_v24 }
  0x7d   :  { %1522 = vmatprep.subr.bf16.mxu0 %v1623_v20 }
  0xf6   :  { %v1209_v26 = vpop.f32.mrb[0].mxu0 }
  0xf7   :  { %v1231_v27 = vpop.f32.mrb[0].mxu1  ;;  %v1210_v28 = vpop.f32.mrb[1].mxu0 }
  0xf8   :  { %v1232_v29 = vpop.f32.mrb[1].mxu1  ;;  %v1211_v30 = vadd.f32 %v1210_v28, %v1209_v26  ;;  %v1212_v32 = vpop.f32.mrb[2].mxu0 }
  0xf9   :  { %v1233_v31 = vadd.f32 %v1232_v29, %v1231_v27  ;;  %v1234_v33 = vpop.f32.mrb[2].mxu1  ;;  %v1213_v34 = vpop.f32.mrb[3].mxu0 }
  0xfa   :  { %v1235_v35 = vpop.f32.mrb[3].mxu1 }
  0xfb   :  { %v650_v36 = vadd.f32 %v1233_v31, %v1211_v30 }
 0x116   :  { %v1253_v37 = vpop.f32.mrb[4].mxu0 }
 0x117   :  { %v1254_v38 = vpop.f32.mrb[5].mxu0  ;;  %v1275_v39 = vpop.f32.mrb[4].mxu1 }
 0x118   :  { %v1255_v40 = vadd.f32 %v1254_v38, %v1253_v37  ;;  %v1256_v41 = vpop.f32.mrb[6].mxu0  ;;  %v1276_v42 = vpop.f32.mrb[5].mxu1 }
 0x119   :  { %v1257_v43 = vpop.f32.mrb[7].mxu0  ;;  %v1277_v44 = vadd.f32 %v1276_v42, %v1275_v39  ;;  %v1278_v45 = vpop.f32.mrb[6].mxu1 }
 0x11a   :  { %v690_v46 = vadd.f32 %v1255_v40, %v650_v36  ;;  %v1279_v47 = vpop.f32.mrb[7].mxu1 }
 0x11c   :  { %v730_v49 = vadd.f32 %v1277_v44, %v690_v46 }
 0x11e   :  { %v735_v50 = vadd.f32 %v730_v49, %v46_v48 }
 0x120   :  { %737 = vst.msk [vmem:[#allocation2] sm:$0xff] %vm44_vm1, %v735_v50 }
 0x127   :  { %v741_v62 = vld [vmem:[#allocation2] sm:$0xff] }
 0x128   :  { %v749_v0 = vadd.f32 %v1188_v63, %v741_v62 }
 0x136   :  { %v840_v54 = vpop.f32.mrb[8].mxu0 }
 0x137   :  { %v841_v55 = vadd.f32 %v1189_v51, %v840_v54  ;;  %v1371_v56 = vpop.f32.mrb[9].mxu0 }
 0x139   :  { %v844_v58 = vmax.f32 %v841_v55, 0.0 }
 0x13b   :  { %1405 = vmatmul.mubr.f32.vlgmr.msra.gmra.mrb[8].mxu1 %v844_v58 }
 0x13c   :  { %1527 = vmatpush3.bf16.msra.mxu1 %v1526_v57  ;;  %1450 = vmatprep.mubr.msk.f32.mxu1 %vm1624_vm0, %v1625_v25  ;;  %v1523_v25 = vpack.c.bf16 %v957_v2, %v956_v1 }
 0x13d   :  { %1528 = vmatprep.subr.bf16.mxu1 %v1623_v20  ;;  %v1190_v20 = vld [vmem:[%s2131_s7] ss:$0 sm:$0xff] }
 0x13e   :  { %1524 = vmatpush3.bf16.msra.mxu0 %v1523_v25 }
 0x140   :  { %1530 = vmatpush3.bf16.msra.mxu1 %v1529_v61 }
 0x143   :  { %1451 = vmatmul.mubr.msk.f32.vlgmr.msra.gmra.mrb[10].mxu1 %vm44_vm1, %v749_v0 }
 0x20e   :  { %v934_v3 = vpop.f32.mrb[8].mxu1 }
 0x20f   :  { %v935_v4 = vadd.f32 %v1190_v20, %v934_v3  ;;  %v1406_v5 = vpop.f32.mrb[9].mxu1 }
 0x211   :  { %1440 = vmatmul.mubr.f32.vlgmr.msra.gmra.mrb[10].mxu0 %v935_v4 }
 0x216   :  { %v1097_v6 = vpop.f32.mrb[10].mxu1 }
 0x217   :  { %v1452_v7 = vpop.f32.mrb[11].mxu1 }
 0x2e4   :  { %v1024_v8 = vpop.f32.mrb[10].mxu0 }
 0x2e5   :  { %v1098_v10 = vadd.f32 %v1097_v6, %v1024_v8  ;;  %v1441_v11 = vpop.f32.mrb[11].mxu0 }
 0x2e7   :  { %v1108_v12 = vadd.f32 %v1192_v9, %v1098_v10 }
 0x2e9   :  { %1109 = vst [vmem:[#allocation3] sm:$0xff] %v1108_v12 }
 0x2ea   :  { %1610 = shalt.err (!%p1607_p4)
}
 0x2eb   :  { %s1611_s27 = scalar_lea.hbm %s2135_s11, 128 }
 0x2ec   :  { %p1612_p5 = scmp.ne.s32.totalorder %s2135_s11, %s1611_s27  ;;  %p1615_p6 = scmp.lt.u32.totalorder %s1611_s27, %s2135_s11 }
 0x2ee   :  { %p1617_p7 = pnand %p1615_p6, %p1612_p5 }
 0x2f0   :  { %1620 = shalt.err (!%p1617_p7)
}
 0x2f1   :  { %1119 = dma.vmem_to_hbm [thread:$0]  %s1117_s25, 128, %s2135_s11, [#allocation4]  }
 0x2f2   :  { %1621 = dma.done.wait [#allocation4], 128  }
 0x2f3   :  { %1622 = vsyncadd [#allocation4], 4294967168 }
 0x2f4   :  { %1123 = vsyncpa [#allocation4], 1 }

</bundles_post_ra>
